<compile_context>
chip_gen: v7x
topology: tpu7x:2x2x1
jax: 0.10.0
libtpu: 0.0.40
codegen_flags: <defaults>
</compile_context>

<pallas_src>
import jax
import jax.numpy as jnp
from jax.experimental import pallas as pl
from jax.experimental.pallas import tpu as pltpu

# ---- small-shape config consistent with the module structure ----
B = 2                    # batch
H = 4                    # "height" of the 2D input
W = 24                   # "width"  of the 2D input
KW = 8                   # conv kernel width (module uses 200; scaled down)
WOUT = W - KW + 1
SEQ_LEN = H * WOUT       # flattened features into fc1 (module: 24447)
D1 = 512                 # fc1 out_features
H_DIM = 128              # fc2 out_features (h_dim)
OUT_DIM = 2              # fc3 out_features


def fused_forward_kernel(x_ref, band_ref, cb_ref, w1_ref, b1_ref,
                         w2_ref, b2_ref, w3_ref, b3_ref, o_ref):
    """conv(1,KW) + ReLU + flatten + fc1 + ReLU + fc2 + ReLU + fc3, fused."""
    # x_ref:  [B, H*W] (VMEM)    band_ref: [H*W, H*WOUT]   cb_ref: [1,1] (SMEM)
    # w1_ref: [H*WOUT, D1]       b1_ref: [1, D1]
    # w2_ref: [D1, H_DIM]        b2_ref: [1, H_DIM]
    # w3_ref: [H_DIM, OUT_DIM]   b3_ref: [1, OUT_DIM]
    # o_ref:  [B, OUT_DIM]
    # Conv (all rows at once) + flatten, folded into one banded matmul.
    conv = jnp.dot(x_ref[...], band_ref[...], preferred_element_type=jnp.float32)
    conv = jnp.maximum(conv + cb_ref[0, 0], 0.0)                    # conv bias + ReLU

    h1 = jnp.dot(conv, w1_ref[...], preferred_element_type=jnp.float32) + b1_ref[...]
    h1 = jnp.maximum(h1, 0.0)                                       # act1 (dropout p=0.0 -> id)

    h2 = jnp.dot(h1, w2_ref[...], preferred_element_type=jnp.float32) + b2_ref[...]
    h2 = jnp.maximum(h2, 0.0)                                       # act2 (dropout p=0.0 -> id)

    o_ref[...] = (jnp.dot(h2, w3_ref[...], preferred_element_type=jnp.float32)
                  + b3_ref[...])


def _block_diag_band(cw, h, w, kw):
    """[H*W, H*WOUT] block-diagonal Toeplitz so that
    (x.reshape(B, H*W) @ band)[:, h*WOUT + j] == sum_k x[:, h, j+k] * cw[k],
    i.e. the per-row valid cross-correlation already in torch .view(B,-1) order."""
    wout = w - kw + 1
    r = jax.lax.broadcasted_iota(jnp.int32, (h * w, h * wout), 0)
    c = jax.lax.broadcasted_iota(jnp.int32, (h * w, h * wout), 1)
    rh, rw = r // w, r % w          # input  (row, position) of this band entry
    ch, cj = c // wout, c % wout    # output (row, position) of this band entry
    k = rw - cj                     # conv tap index
    taps = cw[0, jnp.clip(k, 0, kw - 1)]
    valid = (rh == ch) & (k >= 0) & (k < kw)
    return jnp.where(valid, taps, 0.0).astype(jnp.float32)


def identity_forward(x, params):
    cw, cb, w1, b1, w2, b2, w3, b3 = params
    b_, h_, w_ = x.shape

    # One-time layout plumbing (fused by jit; none of it is per-element glue on x
    # beyond a contiguous reshape).
    band = _block_diag_band(cw, h_, w_, KW)            # [H*W, H*WOUT]
    x_flat = x.reshape(b_, h_ * w_)                    # [B, H*W]

    vmem = pl.BlockSpec(memory_space=pltpu.MemorySpace.VMEM)
    smem = pl.BlockSpec(memory_space=pltpu.MemorySpace.SMEM)

    return pl.pallas_call(
        fused_forward_kernel,
        out_shape=jax.ShapeDtypeStruct((b_, OUT_DIM), jnp.float32),
        in_specs=[vmem, vmem, smem, vmem, vmem, vmem, vmem, vmem, vmem],
        out_specs=vmem,
    )(x_flat, band, cb, w1, b1, w2, b2, w3, b3)


identity_forward = jax.jit(identity_forward)


def reference_forward(x, params):
    """Pure-JAX reference matching the PyTorch module semantics."""
    cw, cb, w1, b1, w2, b2, w3, b3 = params
    b_, h_, w_ = x.shape
    wout = w_ - KW + 1
    hi = jax.lax.Precision.HIGHEST
    conv = sum(x[:, :, k:k + wout] * cw[0, k] for k in range(KW)) + cb[0, 0]
    conv = jnp.maximum(conv, 0.0)
    flat = conv.reshape(b_, h_ * wout)                     # torch .view(B, -1)
    h1 = jnp.maximum(jnp.dot(flat, w1, precision=hi) + b1, 0.0)
    h2 = jnp.maximum(jnp.dot(h1, w2, precision=hi) + b2, 0.0)
    return jnp.dot(h2, w3, precision=hi) + b3


def init_params(key):
    """Deterministic PyTorch-style uniform(-1/sqrt(fan_in), 1/sqrt(fan_in)) init."""
    ks = jax.random.split(key, 8)

    def u(k, shape, fan_in):
        bound = 1.0 / (fan_in ** 0.5)
        return jax.random.uniform(k, shape, jnp.float32, -bound, bound)

    cw = u(ks[0], (1, KW), KW)             # conv1.weight [1,1,1,KW] -> [1, KW]
    cb = u(ks[1], (1, 1), KW)              # conv1.bias (scalar)
    w1 = u(ks[2], (SEQ_LEN, D1), SEQ_LEN)  # fc1.weight stored [in, out]
    b1 = u(ks[3], (1, D1), SEQ_LEN)
    w2 = u(ks[4], (D1, H_DIM), D1)
    b2 = u(ks[5], (1, H_DIM), D1)
    w3 = u(ks[6], (H_DIM, OUT_DIM), H_DIM)
    b3 = u(ks[7], (1, OUT_DIM), H_DIM)
    return (cw, cb, w1, b1, w2, b2, w3, b3)


if __name__ == "__main__":
    key = jax.random.PRNGKey(0)
    kx, kp = jax.random.split(key)
    x = jax.random.normal(kx, (B, H, W), jnp.float32)
    params = init_params(kp)

    out = jax.block_until_ready(identity_forward(x, params))
    assert out.shape == (B, OUT_DIM), out.shape
    assert out.dtype == jnp.float32

    ref = jax.block_until_ready(reference_forward(x, params))
    assert jnp.allclose(out, ref, rtol=2e-2, atol=2e-2), (out, ref)
    print("KERNEL_OK")
</pallas_src>

<mosaic_0001>
module attributes {stable_mosaic.version = 11 : i64} {
  func.func @fused_forward_kernel(%arg0: memref<2x96xf32, #tpu.memory_space<vmem>>, %arg1: memref<96x68xf32, #tpu.memory_space<vmem>>, %arg2: memref<1x1xf32, #tpu.memory_space<smem>>, %arg3: memref<68x512xf32, #tpu.memory_space<vmem>>, %arg4: memref<1x512xf32, #tpu.memory_space<vmem>>, %arg5: memref<512x128xf32, #tpu.memory_space<vmem>>, %arg6: memref<1x128xf32, #tpu.memory_space<vmem>>, %arg7: memref<128x2xf32, #tpu.memory_space<vmem>>, %arg8: memref<1x2xf32, #tpu.memory_space<vmem>>, %arg9: memref<2x2xf32, #tpu.memory_space<vmem>>) attributes {dimension_semantics = [], scalar_prefetch = 0 : i64, scratch_operands = 0 : i64, tpu.core_type = #tpu.core_type<tc>} {
    %c0 = arith.constant 0 : index
    %c0_0 = arith.constant 0 : index
    %0 = vector.load %arg0[%c0, %c0_0] : memref<2x96xf32, #tpu.memory_space<vmem>>, vector<2x96xf32>
    %c0_1 = arith.constant 0 : index
    %c0_2 = arith.constant 0 : index
    %1 = vector.load %arg1[%c0_1, %c0_2] : memref<96x68xf32, #tpu.memory_space<vmem>>, vector<96x68xf32>
    %cst = arith.constant dense<0.000000e+00> : vector<2x68xf32>
    %2 = tpu.matmul %0, %1, %cst {dimension_numbers = #tpu.dot_dimension_numbers<[1], [0], [0], [1], [0, 0, 1, 1], [], []>} : vector<2x96xf32>, vector<96x68xf32>, vector<2x68xf32> -> vector<2x68xf32>
    %c0_3 = arith.constant 0 : index
    %c0_4 = arith.constant 0 : index
    %3 = memref.load %arg2[%c0_3, %c0_4] : memref<1x1xf32, #tpu.memory_space<smem>>
    %4 = vector.broadcast %3 : f32 to vector<2x68xf32>
    %5 = arith.addf %2, %4 : vector<2x68xf32>
    %cst_5 = arith.constant 0.000000e+00 : f32
    %6 = vector.broadcast %cst_5 : f32 to vector<2x68xf32>
    %7 = arith.maximumf %5, %6 : vector<2x68xf32>
    %c0_6 = arith.constant 0 : index
    %c0_7 = arith.constant 0 : index
    %8 = vector.load %arg3[%c0_6, %c0_7] : memref<68x512xf32, #tpu.memory_space<vmem>>, vector<68x512xf32>
    %cst_8 = arith.constant dense<0.000000e+00> : vector<2x512xf32>
    %9 = tpu.matmul %7, %8, %cst_8 {dimension_numbers = #tpu.dot_dimension_numbers<[1], [0], [0], [1], [0, 0, 1, 1], [], []>} : vector<2x68xf32>, vector<68x512xf32>, vector<2x512xf32> -> vector<2x512xf32>
    %c0_9 = arith.constant 0 : index
    %c0_10 = arith.constant 0 : index
    %10 = vector.load %arg4[%c0_9, %c0_10] : memref<1x512xf32, #tpu.memory_space<vmem>>, vector<1x512xf32>
    %11 = vector.broadcast %10 : vector<1x512xf32> to vector<2x512xf32>
    %12 = arith.addf %9, %11 : vector<2x512xf32>
    %cst_11 = arith.constant 0.000000e+00 : f32
    %13 = vector.broadcast %cst_11 : f32 to vector<2x512xf32>
    %14 = arith.maximumf %12, %13 : vector<2x512xf32>
    %c0_12 = arith.constant 0 : index
    %c0_13 = arith.constant 0 : index
    %15 = vector.load %arg5[%c0_12, %c0_13] : memref<512x128xf32, #tpu.memory_space<vmem>>, vector<512x128xf32>
    %cst_14 = arith.constant dense<0.000000e+00> : vector<2x128xf32>
    %16 = tpu.matmul %14, %15, %cst_14 {dimension_numbers = #tpu.dot_dimension_numbers<[1], [0], [0], [1], [0, 0, 1, 1], [], []>} : vector<2x512xf32>, vector<512x128xf32>, vector<2x128xf32> -> vector<2x128xf32>
    %c0_15 = arith.constant 0 : index
    %c0_16 = arith.constant 0 : index
    %17 = vector.load %arg6[%c0_15, %c0_16] : memref<1x128xf32, #tpu.memory_space<vmem>>, vector<1x128xf32>
    %18 = vector.broadcast %17 : vector<1x128xf32> to vector<2x128xf32>
    %19 = arith.addf %16, %18 : vector<2x128xf32>
    %cst_17 = arith.constant 0.000000e+00 : f32
    %20 = vector.broadcast %cst_17 : f32 to vector<2x128xf32>
    %21 = arith.maximumf %19, %20 : vector<2x128xf32>
    %c0_18 = arith.constant 0 : index
    %c0_19 = arith.constant 0 : index
    %22 = vector.load %arg7[%c0_18, %c0_19] : memref<128x2xf32, #tpu.memory_space<vmem>>, vector<128x2xf32>
    %cst_20 = arith.constant dense<0.000000e+00> : vector<2x2xf32>
    %23 = tpu.matmul %21, %22, %cst_20 {dimension_numbers = #tpu.dot_dimension_numbers<[1], [0], [0], [1], [0, 0, 1, 1], [], []>} : vector<2x128xf32>, vector<128x2xf32>, vector<2x2xf32> -> vector<2x2xf32>
    %c0_21 = arith.constant 0 : index
    %c0_22 = arith.constant 0 : index
    %24 = vector.load %arg8[%c0_21, %c0_22] : memref<1x2xf32, #tpu.memory_space<vmem>>, vector<1x2xf32>
    %25 = vector.broadcast %24 : vector<1x2xf32> to vector<2x2xf32>
    %26 = arith.addf %23, %25 : vector<2x2xf32>
    %c0_23 = arith.constant 0 : index
    %c0_24 = arith.constant 0 : index
    %27 = vector.load %arg9[%c0_23, %c0_24] : memref<2x2xf32, #tpu.memory_space<vmem>>, vector<2x2xf32>
    tpu.vector_store %arg9[%c0_23, %c0_24], %26 {strides = array<i32>} : memref<2x2xf32, #tpu.memory_space<vmem>>, vector<2x2xf32>,
    return
  }
}

</mosaic_0001>

<bundles_post_ra>
// kernel: identity_forward.1
= control target key start
LH: loop header
LB: loop body
LE: loop exit
PB: predicated region body
PF: predicated region fallthrough
CT: control target
= control target key end

     0   :  { %v1003_v3 = vmov 0.0|0.0   ;;  %vm1004_vm0 = vmmov 0   ;;  %v1005_v6 = vmov 0.0   ;;  %s1494_s0 = inlined_call_operand.vmem [shape: f32[2,96], index: 0, kind: input, shape index: {}]   ;;  %s1495_s1 = inlined_call_operand.vmem [shape: f32[96,68], index: 1, kind: input, shape index: {}]   ;;  %s1496_s2 = inlined_call_operand.<no memory space> [shape: f32[1,1], index: 2, kind: input, shape index: {}]   ;;  %s1497_s3 = inlined_call_operand.vmem [shape: f32[68,512], index: 3, kind: input, shape index: {}]   ;;  %s1498_s4 = inlined_call_operand.vmem [shape: f32[1,512], index: 4, kind: input, shape index: {}]   ;;  %s1499_s5 = inlined_call_operand.vmem [shape: f32[512,128], index: 5, kind: input, shape index: {}]   ;;  %s1500_s6 = inlined_call_operand.vmem [shape: f32[1,128], index: 6, kind: input, shape index: {}]   ;;  %s1501_s7 = inlined_call_operand.vmem [shape: f32[128,2], index: 7, kind: input, shape index: {}]   ;;  %s1502_s8 = inlined_call_operand.vmem [shape: f32[1,2], index: 8, kind: input, shape index: {}]   ;;  %s1503_s9 = inlined_call_operand.hbm [shape: f32[2,2], index: 9, kind: output, shape index: {}]  }
   0x1   :  { %v35_v0 = vld [vmem:[%s1495_s1] sm:$0xff]  ;;  %v36_v1 = vld [vmem:[%s1495_s1 + $0x8] sm:$0xff]  ;;  %v37_v2 = vld [vmem:[%s1495_s1 + $0x10] sm:$0xff]  ;;  %837 = vmatprep.subr.bf16.mxu0 %v1003_v3  ;;  %799 = vmatprep.mubr.msk.f32.mxu0 %vm1004_vm0, %v1005_v6 }
   0x2   :  { %v838_v4 = vpack.c.bf16 %v36_v1, %v35_v0  ;;  %v38_v5 = vld [vmem:[%s1495_s1 + $0x18] sm:$0xff]  ;;  %263 = vmatprep.mubr.f32.mxu1 %v1005_v6  ;;  %v39_v8 = vld [vmem:[%s1495_s1 + $0x20] sm:$0xff]  ;;  %v40_v9 = vld [vmem:[%s1495_s1 + $0x28] sm:$0xff] }
   0x3   :  { %v841_v7 = vpack.c.bf16 %v38_v5, %v37_v2  ;;  %v125_v10 = vld [vmem:[%s1497_s3 + $0x8] sm:$0xff]  ;;  %v124_v13 = vld [vmem:[%s1497_s3] sm:$0xff]  ;;  %v844_v20 = vpack.c.bf16 %v40_v9, %v39_v8  ;;  %v41_v24 = vld [vmem:[%s1495_s1 + $0x30] sm:$0xff] }
   0x4   :  { %839 = vmatpush3.bf16.msra.mxu0 %v838_v4  ;;  %v129_v11 = vld [vmem:[%s1497_s3 + $0x28] sm:$0xff]  ;;  %v128_v14 = vld [vmem:[%s1497_s3 + $0x20] sm:$0xff]  ;;  %v42_v25 = vld [vmem:[%s1495_s1 + $0x38] sm:$0xff] }
   0x5   :  { %840 = vmatprep.subr.bf16.mxu0 %v1003_v3  ;;  %v855_v12 = vpack.c.bf16 %v129_v11, %v125_v10  ;;  %v133_v15 = vld [vmem:[%s1497_s3 + $0x48] sm:$0xff]  ;;  %v857_v16 = vpack.c.bf16 %v128_v14, %v124_v13  ;;  %v132_v18 = vld [vmem:[%s1497_s3 + $0x40] sm:$0xff] }
   0x6   :  { %v137_v17 = vld [vmem:[%s1497_s3 + $0x68] sm:$0xff]  ;;  %v136_v19 = vld [vmem:[%s1497_s3 + $0x60] sm:$0xff] }
   0x7   :  { %856 = vmatprep.subr.bf16.mxu1 %v855_v12  ;;  %v859_v21 = vpack.c.bf16 %v137_v17, %v133_v15  ;;  %v141_v22 = vld [vmem:[%s1497_s3 + $0x88] sm:$0xff]  ;;  %v861_v26 = vpack.c.bf16 %v136_v19, %v132_v18  ;;  %v140_v28 = vld [vmem:[%s1497_s3 + $0x80] sm:$0xff] }
   0x8   :  { %842 = vmatpush3.bf16.msra.mxu0 %v841_v7  ;;  %v145_v23 = vld [vmem:[%s1497_s3 + $0xa8] sm:$0xff]  ;;  %858 = vmatpush1.bf16.msra.mxu1 %v857_v16  ;;  %v144_v29 = vld [vmem:[%s1497_s3 + $0xa0] sm:$0xff] }
   0x9   :  { %843 = vmatprep.subr.bf16.mxu0 %v1003_v3  ;;  %860 = vmatprep.subr.bf16.mxu1 %v859_v21  ;;  %v863_v27 = vpack.c.bf16 %v145_v23, %v141_v22 }
   0xa   :  { %15 = vsyncpa [#allocation4], 0  ;;  %v149_v30 = vld [vmem:[%s1497_s3 + $0xc8] sm:$0xff]  ;;  %v847_v32 = vpack.c.bf16 %v42_v25, %v41_v24  ;;  %v43_v33 = vld [vmem:[%s1495_s1 + $0x40] sm:$0xff]  ;;  %v865_v35 = vpack.c.bf16 %v144_v29, %v140_v28  ;;  %vm49_vm1 = vcmask 785408   ;;  %vm186_vm2 = vcmask 1043456  }
   0xb   :  { %v153_v31 = vld [vmem:[%s1497_s3 + $0xe8] sm:$0xff]  ;;  %v148_v37 = vld [vmem:[%s1497_s3 + $0xc0] sm:$0xff]  ;;  %v45_v40 = vld [vmem:[%s1495_s1 + $0x50] sm:$0xff]  ;;  %vm182_vm3 = vcmask 556032   ;;  %vm650_vm4 = vcmask 9216  }
   0xc   :  { %845 = vmatpush3.bf16.msra.mxu0 %v844_v20  ;;  %v44_v34 = vld [vmem:[%s1495_s1 + $0x48] sm:$0xff]  ;;  %862 = vmatpush1.bf16.msra.mxu1 %v861_v26  ;;  %v867_v36 = vpack.c.bf16 %v153_v31, %v149_v30  ;;  %v152_v38 = vld [vmem:[%s1497_s3 + $0xe0] sm:$0xff]  ;;  %v46_v41 = vld [vmem:[%s1495_s1 + $0x58] sm:$0xff] }
   0xd   :  { %846 = vmatprep.subr.bf16.mxu0 %v1003_v3  ;;  %864 = vmatprep.subr.bf16.mxu1 %v863_v27  ;;  %v850_v39 = vpack.c.bf16 %v44_v34, %v43_v33  ;;  %v869_v42 = vpack.c.bf16 %v152_v38, %v148_v37  ;;  %v853_v43 = vpack.c.bf16 %v46_v41, %v45_v40  ;;  %v34_v44 = vld [vmem:[%s1494_s0] sm:$0x3]  ;;  %v157_v45 = vld [vmem:[%s1497_s3 + $0x108] sm:$0xf]  ;;  %v127_v46 = vld [vmem:[%s1497_s3 + $0x18] sm:$0xff]  ;;  %v48_v27 = vstv %s1496_s2 }
   0xe   :  { %v131_v47 = vld [vmem:[%s1497_s3 + $0x38] sm:$0xff]  ;;  %v156_v48 = vld [vmem:[%s1497_s3 + $0x100] sm:$0xf]  ;;  %v362_v51 = vld [vmem:[%s1499_s5 + $0x88] sm:$0xff] }
   0xf   :  { %v871_v49 = vpack.c.bf16 %v131_v47, %v127_v46  ;;  %v361_v50 = vld [vmem:[%s1499_s5 + $0x80] sm:$0xff]  ;;  %v346_v54 = vld [vmem:[%s1499_s5 + $0x8] sm:$0xff]  ;;  %v363_v55 = vld [vmem:[%s1499_s5 + $0x90] sm:$0xff] }
  0x10   :  { %848 = vmatpush3.bf16.msra.mxu0 %v847_v32  ;;  %866 = vmatpush1.bf16.msra.mxu1 %v865_v35  ;;  %v345_v52 = vld [vmem:[%s1499_s5] sm:$0xff]  ;;  %v887_v53 = vpack.c.bf16 %v362_v51, %v361_v50  ;;  %v364_v56 = vld [vmem:[%s1499_s5 + $0x98] sm:$0xff]  ;;  %v347_v59 = vld [vmem:[%s1499_s5 + $0x10] sm:$0xff] }
  0x11   :  { %849 = vmatprep.subr.bf16.mxu0 %v1003_v3  ;;  %868 = vmatprep.subr.bf16.mxu1 %v867_v36  ;;  %v889_v57 = vpack.c.bf16 %v346_v54, %v345_v52  ;;  %v891_v58 = vpack.c.bf16 %v364_v56, %v363_v55  ;;  %v348_v60 = vld [vmem:[%s1499_s5 + $0x18] sm:$0xff]  ;;  %v365_v61 = vld [vmem:[%s1499_s5 + $0xa0] sm:$0xff]  ;;  %v366_v62 = vld [vmem:[%s1499_s5 + $0xa8] sm:$0xff] }
  0x12   :  { %v893_v63 = vpack.c.bf16 %v348_v60, %v347_v59  ;;  %v895_v0 = vpack.c.bf16 %v366_v62, %v365_v61  ;;  %v349_v1 = vld [vmem:[%s1499_s5 + $0x20] sm:$0xff]  ;;  %v350_v2 = vld [vmem:[%s1499_s5 + $0x28] sm:$0xff]  ;;  %v367_v4 = vld [vmem:[%s1499_s5 + $0xb0] sm:$0xff] }
  0x13   :  { %v368_v5 = vld [vmem:[%s1499_s5 + $0xb8] sm:$0xff]  ;;  %v897_v7 = vpack.c.bf16 %v350_v2, %v349_v1  ;;  %v351_v9 = vld [vmem:[%s1499_s5 + $0x30] sm:$0xff]  ;;  %v369_v11 = vld [vmem:[%s1499_s5 + $0xc0] sm:$0xff] }
  0x14   :  { %851 = vmatpush3.bf16.msra.mxu0 %v850_v39  ;;  %870 = vmatpush1.bf16.msra.mxu1 %v869_v42  ;;  %v899_v8 = vpack.c.bf16 %v368_v5, %v367_v4  ;;  %v352_v10 = vld [vmem:[%s1499_s5 + $0x38] sm:$0xff]  ;;  %v370_v12 = vld [vmem:[%s1499_s5 + $0xc8] sm:$0xff]  ;;  %v353_v15 = vld [vmem:[%s1499_s5 + $0x40] sm:$0xff] }
  0x15   :  { %852 = vmatprep.subr.bf16.mxu0 %v1003_v3  ;;  %667 = vmatprep.subr.msk.mxu1 %vm186_vm2, %v157_v45  ;;  %v901_v13 = vpack.c.bf16 %v352_v10, %v351_v9  ;;  %v903_v14 = vpack.c.bf16 %v370_v12, %v369_v11  ;;  %v354_v16 = vld [vmem:[%s1499_s5 + $0x48] sm:$0xff]  ;;  %v371_v17 = vld [vmem:[%s1499_s5 + $0xd0] sm:$0xff]  ;;  %v372_v18 = vld [vmem:[%s1499_s5 + $0xd8] sm:$0xff] }
  0x16   :  { %v905_v19 = vpack.c.bf16 %v354_v16, %v353_v15  ;;  %v907_v20 = vpack.c.bf16 %v372_v18, %v371_v17  ;;  %v355_v21 = vld [vmem:[%s1499_s5 + $0x50] sm:$0xff]  ;;  %v356_v22 = vld [vmem:[%s1499_s5 + $0x58] sm:$0xff]  ;;  %v373_v23 = vld [vmem:[%s1499_s5 + $0xe0] sm:$0xff] }
  0x17   :  { %v374_v24 = vld [vmem:[%s1499_s5 + $0xe8] sm:$0xff]  ;;  %v909_v25 = vpack.c.bf16 %v356_v22, %v355_v21  ;;  %v126_v28 = vld [vmem:[%s1497_s3 + $0x10] sm:$0xff]  ;;  %v135_v31 = vld [vmem:[%s1497_s3 + $0x58] sm:$0xff] }
  0x18   :  { %854 = vmatpush3.bf16.msra.mxu0 %v853_v43  ;;  %668 = vmatpush1.msk.msra.mxu1 %vm186_vm2, %v156_v48  ;;  %v911_v26 = vpack.c.bf16 %v374_v24, %v373_v23  ;;  %v130_v29 = vld [vmem:[%s1497_s3 + $0x30] sm:$0xff]  ;;  %v139_v32 = vld [vmem:[%s1497_s3 + $0x78] sm:$0xff]  ;;  %v393_v54 = vld [vmem:[%s1499_s5 + $0x180] sm:$0xff] }
  0x19   :  { %872 = vmatprep.subr.bf16.mxu1 %v871_v49  ;;  %888 = vmatprep.subr.bf16.mxu0 %v887_v53  ;;  %v873_v35 = vpack.c.bf16 %v130_v29, %v126_v28  ;;  %v875_v37 = vpack.c.bf16 %v139_v32, %v135_v31  ;;  %v134_v38 = vld [vmem:[%s1497_s3 + $0x50] sm:$0xff]  ;;  %v143_v40 = vld [vmem:[%s1497_s3 + $0x98] sm:$0xff]  ;;  %v394_v55 = vld [vmem:[%s1499_s5 + $0x188] sm:$0xff] }
  0x1a   :  { %v138_v39 = vld [vmem:[%s1497_s3 + $0x70] sm:$0xff]  ;;  %v147_v41 = vld [vmem:[%s1497_s3 + $0xb8] sm:$0xff]  ;;  %v377_v56 = vld [vmem:[%s1499_s5 + $0x100] sm:$0xff]  ;;  %v919_v61 = vpack.c.bf16 %v394_v55, %v393_v54 }
  0x1b   :  { %800 = vmatmul.mubr.msk.f32.vlgmr.msra.gmra.mrb[0].mxu0 %vm49_vm1, %v34_v44  ;;  %v877_v42 = vpack.c.bf16 %v138_v39, %v134_v38  ;;  %v879_v43 = vpack.c.bf16 %v147_v41, %v143_v40  ;;  %v142_v44 = vld [vmem:[%s1497_s3 + $0x90] sm:$0xff]  ;;  %v151_v46 = vld [vmem:[%s1497_s3 + $0xd8] sm:$0xff]  ;;  %v357_v4 = vld [vmem:[%s1499_s5 + $0x60] sm:$0xff] }
  0x1c   :  { %890 = vmatpush3.bf16.msra.mxu0 %v889_v57  ;;  %v146_v45 = vld [vmem:[%s1497_s3 + $0xb0] sm:$0xff]  ;;  %v155_v47 = vld [vmem:[%s1497_s3 + $0xf8] sm:$0xff]  ;;  %v378_v57 = vld [vmem:[%s1499_s5 + $0x108] sm:$0xff] }
  0x1d   :  { %892 = vmatprep.subr.bf16.mxu0 %v891_v58  ;;  %v881_v48 = vpack.c.bf16 %v146_v45, %v142_v44  ;;  %v883_v49 = vpack.c.bf16 %v155_v47, %v151_v46  ;;  %v150_v50 = vld [vmem:[%s1497_s3 + $0xd0] sm:$0xff]  ;;  %v159_v53 = vld [vmem:[%s1497_s3 + $0x118] sm:$0xf]  ;;  %v921_v62 = vpack.c.bf16 %v378_v57, %v377_v56  ;;  %v358_v5 = vld [vmem:[%s1499_s5 + $0x68] sm:$0xff] }
  0x1e   :  { %v154_v51 = vld [vmem:[%s1497_s3 + $0xf0] sm:$0xff]  ;;  %v396_v59 = vld [vmem:[%s1499_s5 + $0x198] sm:$0xff]  ;;  %v398_v9 = vld [vmem:[%s1499_s5 + $0x1a8] sm:$0xff] }
  0x1f   :  { %v885_v52 = vpack.c.bf16 %v154_v51, %v150_v50  ;;  %v395_v58 = vld [vmem:[%s1499_s5 + $0x190] sm:$0xff]  ;;  %v380_v1 = vld [vmem:[%s1499_s5 + $0x118] sm:$0xff]  ;;  %v381_v10 = vld [vmem:[%s1499_s5 + $0x120] sm:$0xff]  ;;  %v162_v50 = vlaneseq }
  0x20   :  { %894 = vmatpush3.bf16.msra.mxu0 %v893_v63  ;;  %v158_v60 = vld [vmem:[%s1497_s3 + $0x110] sm:$0xf]  ;;  %v923_v63 = vpack.c.bf16 %v396_v59, %v395_v58  ;;  %v382_v11 = vld [vmem:[%s1499_s5 + $0x128] sm:$0xff]  ;;  %v376_v15 = vld [vmem:[%s1499_s5 + $0xf8] sm:$0xff] }
  0x21   :  { %896 = vmatprep.subr.bf16.mxu0 %v895_v0  ;;  %v379_v0 = vld [vmem:[%s1499_s5 + $0x110] sm:$0xff]  ;;  %v360_v18 = vld [vmem:[%s1499_s5 + $0x78] sm:$0xff]  ;;  %v385_v29 = vld [vmem:[%s1499_s5 + $0x140] sm:$0xff]  ;;  %v163_v51 = vshrl.u32 %v162_v50, 7 }
  0x22   :  { %v925_v2 = vpack.c.bf16 %v380_v1, %v379_v0  ;;  %v359_v17 = vld [vmem:[%s1499_s5 + $0x70] sm:$0xff]  ;;  %v400_v21 = vld [vmem:[%s1499_s5 + $0x1b8] sm:$0xff]  ;;  %v406_v38 = vld [vmem:[%s1499_s5 + $0x1e8] sm:$0xff] }
  0x23   :  { %v383_v22 = vld [vmem:[%s1499_s5 + $0x130] sm:$0xff]  ;;  %v384_v23 = vld [vmem:[%s1499_s5 + $0x138] sm:$0xff]  ;;  %v389_v41 = vld [vmem:[%s1499_s5 + $0x160] sm:$0xff]  ;;  %v168_v54 = vsub.s32 1, %v163_v51 }
  0x24   :  { %898 = vmatpush3.bf16.msra.mxu0 %v897_v7  ;;  %v397_v7 = vld [vmem:[%s1499_s5 + $0x1a0] sm:$0xff]  ;;  %v403_v31 = vld [vmem:[%s1499_s5 + $0x1d0] sm:$0xff]  ;;  %v408_v45 = vld [vmem:[%s1499_s5 + $0x1f8] sm:$0xff] }
  0x25   :  { %900 = vmatprep.subr.bf16.mxu0 %v899_v8  ;;  %v913_v8 = vpack.c.bf16 %v358_v5, %v357_v4  ;;  %v927_v12 = vpack.c.bf16 %v398_v9, %v397_v7  ;;  %v407_v44 = vld [vmem:[%s1499_s5 + $0x1f0] sm:$0xff]  ;;  %v560_v4 = vld [vmem:[%s1501_s7 + $0x18] sm:$0xff]  ;;  %v172_v7 = vsub.s32 2, %v163_v51 }
  0x26   :  { %v947_v46 = vpack.c.bf16 %v408_v45, %v407_v44  ;;  %v391_v47 = vld [vmem:[%s1499_s5 + $0x170] sm:$0xff] }
  0x28   :  { %902 = vmatpush3.bf16.msra.mxu0 %v901_v13  ;;  %v929_v13 = vpack.c.bf16 %v382_v11, %v381_v10 }
  0x29   :  { %904 = vmatprep.subr.bf16.mxu0 %v903_v14  ;;  %v375_v14 = vld [vmem:[%s1499_s5 + $0xf0] sm:$0xff] }
  0x2a   :  { %v915_v16 = vpack.c.bf16 %v376_v15, %v375_v14 }
  0x2c   :  { %906 = vmatpush3.bf16.msra.mxu0 %v905_v19  ;;  %v399_v19 = vld [vmem:[%s1499_s5 + $0x1b0] sm:$0xff] }
  0x2d   :  { %908 = vmatprep.subr.bf16.mxu0 %v907_v20  ;;  %v917_v20 = vpack.c.bf16 %v360_v18, %v359_v17  ;;  %v931_v24 = vpack.c.bf16 %v400_v21, %v399_v19  ;;  %v562_v17 = vld [vmem:[%s1501_s7 + $0x28] sm:$0xff]  ;;  %v563_v19 = vld [vmem:[%s1501_s7 + $0x30] sm:$0xff]  ;;  %v565_v21 = vld [vmem:[%s1501_s7 + $0x40] sm:$0xff] }
  0x30   :  { %910 = vmatpush3.bf16.msra.mxu0 %v909_v25  ;;  %v933_v25 = vpack.c.bf16 %v384_v23, %v383_v22  ;;  %v566_v23 = vld [vmem:[%s1501_s7 + $0x48] sm:$0xff] }
  0x31   :  { %912 = vmatprep.subr.bf16.mxu0 %v911_v26  ;;  %v401_v26 = vld [vmem:[%s1499_s5 + $0x1c0] sm:$0xff] }
  0x34   :  { %914 = vmatpush3.bf16.msra.mxu0 %v913_v8  ;;  %v176_v8 = vsub.s32 3, %v163_v51 }
  0x35   :  { %916 = vmatprep.subr.bf16.mxu0 %v915_v16 }
  0x38   :  { %918 = vmatpush3.bf16.msra.mxu0 %v917_v20  ;;  %v564_v20 = vld [vmem:[%s1501_s7 + $0x38] sm:$0xff] }
  0x39   :  { %951 = vmatprep.subr.bf16.mxu0 %v1003_v3  ;;  %v961_v22 = vpack.c.bf16 %v564_v20, %v563_v19 }
  0xee   :  { %v119_v30 = vpop.f32.mrb[0].mxu0 }
  0xef   :  { %v120_v33 = vadd.f32 %v119_v30, %v48_v27  ;;  %v801_v34 = vpop.f32.mrb[1].mxu0  ;;  %v402_v27 = vld [vmem:[%s1499_s5 + $0x1c8] sm:$0xff] }
  0xf0   :  { %v935_v28 = vpack.c.bf16 %v402_v27, %v401_v26  ;;  %v386_v30 = vld [vmem:[%s1499_s5 + $0x148] sm:$0xff]  ;;  %v387_v34 = vld [vmem:[%s1499_s5 + $0x150] sm:$0xff]  ;;  %v568_v26 = vld [vmem:[%s1501_s7 + $0x58] sm:$0xff] }
  0xf1   :  { %v123_v36 = vmax.f32 %v120_v33, 0.0  ;;  %v937_v32 = vpack.c.bf16 %v386_v30, %v385_v29  ;;  %v404_v33 = vld [vmem:[%s1499_s5 + $0x1d8] sm:$0xff]  ;;  %v570_v29 = vld [vmem:[%s1501_s7 + $0x68] sm:$0xff] }
  0xf3   :  { %669 = vmatmul.mubr.msk.f32.vlgmr.msra.gmra.mrb[0].mxu1 %vm182_vm3, %v123_v36 }
  0xf4   :  { %874 = vmatpush1.bf16.msra.mxu1 %v873_v35  ;;  %334 = vmatprep.mubr.f32.mxu1 %v1005_v6  ;;  %v388_v35 = vld [vmem:[%s1499_s5 + $0x158] sm:$0xff] }
  0xf5   :  { %876 = vmatprep.subr.bf16.mxu1 %v875_v37  ;;  %v405_v37 = vld [vmem:[%s1499_s5 + $0x1e0] sm:$0xff]  ;;  %v941_v39 = vpack.c.bf16 %v388_v35, %v387_v34 }
  0xf6   :  { %v943_v40 = vpack.c.bf16 %v406_v38, %v405_v37  ;;  %v673_v37 = vld [vmem:[%s1500_s6] ss:$0 sm:$0xff] }
  0xf8   :  { %878 = vmatpush1.bf16.msra.mxu1 %v877_v42  ;;  %v390_v42 = vld [vmem:[%s1499_s5 + $0x168] sm:$0xff] }
  0xf9   :  { %880 = vmatprep.subr.bf16.mxu1 %v879_v43  ;;  %v945_v43 = vpack.c.bf16 %v390_v42, %v389_v41 }
  0xfc   :  { %882 = vmatpush1.bf16.msra.mxu1 %v881_v48  ;;  %v392_v48 = vld [vmem:[%s1499_s5 + $0x178] sm:$0xff] }
  0xfd   :  { %884 = vmatprep.subr.bf16.mxu1 %v883_v49  ;;  %v949_v49 = vpack.c.bf16 %v392_v48, %v391_v47 }
 0x100   :  { %886 = vmatpush1.bf16.msra.mxu1 %v885_v52  ;;  %v164_v52 = vsub.s32 0, %v163_v51 }
 0x101   :  { %670 = vmatprep.subr.msk.mxu1 %vm186_vm2, %v159_v53  ;;  %v160_v53 = vld [vmem:[%s1498_s4] sm:$0xf] }
 0x102   :  { %v165_v55 = vrot.slane %v160_v53, %v164_v52  ;;  %v169_v56 = vrot.slane %v160_v53, %v168_v54  ;;  %v173_v9 = vrot.slane %v160_v53, %v172_v7  ;;  %v177_v10 = vrot.slane %v160_v53, %v176_v8 }
 0x104   :  { %671 = vmatpush1.msk.msra.mxu1 %vm186_vm2, %v158_v60  ;;  %v557_v60 = vld [vmem:[%s1501_s7] sm:$0xff] }
 0x105   :  { %672 = vmatmul.mubr.msk.f32.vlgmr.msra.gmra.mrb[2].mxu1 %vm182_vm3, %v123_v36  ;;  %920 = vmatprep.subr.bf16.mxu1 %v919_v61  ;;  %v939_v36 = vpack.c.bf16 %v404_v33, %v403_v31  ;;  %v558_v61 = vld [vmem:[%s1501_s7 + $0x8] sm:$0xff]  ;;  %v571_v31 = vld [vmem:[%s1501_s7 + $0x70] sm:$0xff] }
 0x106   :  { %922 = vmatpush3.bf16.msra.mxu1 %v921_v62  ;;  %v952_v0 = vpack.c.bf16 %v558_v61, %v557_v60 }
 0x107   :  { %924 = vmatprep.subr.bf16.mxu1 %v923_v63 }
 0x10a   :  { %926 = vmatpush3.bf16.msra.mxu1 %v925_v2  ;;  %v559_v2 = vld [vmem:[%s1501_s7 + $0x10] sm:$0xff] }
 0x10b   :  { %928 = vmatprep.subr.bf16.mxu1 %v927_v12  ;;  %v955_v5 = vpack.c.bf16 %v560_v4, %v559_v2 }
 0x10e   :  { %930 = vmatpush3.bf16.msra.mxu1 %v929_v13 }
 0x10f   :  { %932 = vmatprep.subr.bf16.mxu1 %v931_v24  ;;  %v964_v24 = vpack.c.bf16 %v566_v23, %v565_v21 }
 0x112   :  { %934 = vmatpush3.bf16.msra.mxu1 %v933_v25  ;;  %v567_v25 = vld [vmem:[%s1501_s7 + $0x50] sm:$0xff] }
 0x113   :  { %936 = vmatprep.subr.bf16.mxu1 %v935_v28  ;;  %v967_v27 = vpack.c.bf16 %v568_v26, %v567_v25  ;;  %v569_v28 = vld [vmem:[%s1501_s7 + $0x60] sm:$0xff] }
 0x114   :  { %v970_v30 = vpack.c.bf16 %v570_v29, %v569_v28 }
 0x116   :  { %938 = vmatpush3.bf16.msra.mxu1 %v937_v32  ;;  %v572_v32 = vld [vmem:[%s1501_s7 + $0x78] sm:$0xff] }
 0x117   :  { %940 = vmatprep.subr.bf16.mxu1 %v939_v36  ;;  %v973_v33 = vpack.c.bf16 %v572_v32, %v571_v31 }
 0x11a   :  { %942 = vmatpush3.bf16.msra.mxu1 %v941_v39 }
 0x11b   :  { %944 = vmatprep.subr.bf16.mxu1 %v943_v40 }
 0x11e   :  { %946 = vmatpush3.bf16.msra.mxu1 %v945_v43  ;;  %v674_v43 = vld [vmem:[%s1502_s8] ss:$0 sm:$0xff] }
 0x11f   :  { %948 = vmatprep.subr.bf16.mxu1 %v947_v46 }
 0x122   :  { %950 = vmatpush3.bf16.msra.mxu1 %v949_v49 }
 0x1c6   :  { %v265_v57 = vpop.f32.mrb[0].mxu1 }
 0x1c7   :  { %v266_v58 = vadd.f32 %v265_v57, %v165_v55  ;;  %v267_v59 = vpop.f32.mrb[1].mxu1 }
 0x1c8   :  { %v268_v62 = vadd.f32 %v267_v59, %v169_v56 }
 0x1c9   :  { %v341_v1 = vmax.f32 %v266_v58, 0.0 }
 0x1ca   :  { %v342_v63 = vmax.f32 %v268_v62, 0.0 }
 0x1cc   :  { %480 = vmatprep.mubr.f32.mxu0 %v342_v63 }
 0x1cd   :  { %481 = vmatmul.mubr.f32.vlgmr.msra.gmra.mrb[2].mxu0 %v341_v1 }
 0x1ce   :  { %953 = vmatpush3.bf16.msra.mxu0 %v952_v0  ;;  %834 = vmatprep.mubr.msk.f32.mxu0 %vm1004_vm0, %v1005_v6  ;;  %v561_v6 = vld [vmem:[%s1501_s7 + $0x20] sm:$0xff]  ;;  %s1006_s7 = smov [#allocation3]  }
 0x1cf   :  { %954 = vmatprep.subr.bf16.mxu0 %v1003_v3  ;;  %v958_v18 = vpack.c.bf16 %v562_v17, %v561_v6  ;;  %s658_s12 = sshll.u32 %s1006_s7, 4  ;;  %s659_s12 = int_to_ptr.vmem [resolvable:$true] %s658_s12 }
 0x1d0   :  { %s979_s6 = scalar_lea.vmem %s659_s12, 32  ;;  %p984_p1 = scmp.lt.s32.totalorder %s659_s12, %s659_s12 }
 0x1d1   :  { %p980_p0 = scmp.ne.s32.totalorder %s659_s12, %s979_s6  ;;  %p985_p2 = scmp.lt.s32.totalorder %s979_s6, %s979_s6 }
 0x1d2   :  { %956 = vmatpush3.bf16.msra.mxu0 %v955_v5 }
 0x1d3   :  { %957 = vmatprep.subr.bf16.mxu0 %v1003_v3  ;;  %p986_p3 = por %p985_p2, %p984_p1 }
 0x1d5   :  { %p987_p4 = pnand %p986_p3, %p980_p0 }
 0x1d6   :  { %959 = vmatpush3.bf16.msra.mxu0 %v958_v18 }
 0x1d7   :  { %960 = vmatprep.subr.bf16.mxu0 %v1003_v3 }
 0x1d8   :  { %v336_v11 = vpop.f32.mrb[2].mxu1 }
 0x1d9   :  { %v337_v12 = vadd.f32 %v336_v11, %v173_v9  ;;  %v338_v13 = vpop.f32.mrb[3].mxu1 }
 0x1da   :  { %v339_v14 = vadd.f32 %v338_v13, %v177_v10  ;;  %962 = vmatpush3.bf16.msra.mxu0 %v961_v22 }
 0x1db   :  { %v343_v16 = vmax.f32 %v337_v12, 0.0  ;;  %963 = vmatprep.subr.bf16.mxu0 %v1003_v3 }
 0x1dc   :  { %v344_v15 = vmax.f32 %v339_v14, 0.0 }
 0x1de   :  { %550 = vmatprep.mubr.f32.mxu1 %v344_v15  ;;  %965 = vmatpush3.bf16.msra.mxu0 %v964_v24 }
 0x1df   :  { %551 = vmatmul.mubr.f32.vlgmr.msra.gmra.mrb[4].mxu1 %v343_v16  ;;  %966 = vmatprep.subr.bf16.mxu0 %v1003_v3 }
 0x1e2   :  { %968 = vmatpush3.bf16.msra.mxu0 %v967_v27 }
 0x1e3   :  { %969 = vmatprep.subr.bf16.mxu0 %v1003_v3 }
 0x1e6   :  { %971 = vmatpush3.bf16.msra.mxu0 %v970_v30 }
 0x1e7   :  { %972 = vmatprep.subr.bf16.mxu0 %v1003_v3 }
 0x1ea   :  { %974 = vmatpush3.bf16.msra.mxu0 %v973_v33 }
 0x2a0   :  { %v720_v34 = vpop.f32.mrb[2].mxu0 }
 0x2a1   :  { %v721_v35 = vpop.f32.mrb[3].mxu0 }
 0x2a2   :  { %v722_v36 = vadd.f32 %v721_v35, %v720_v34 }
 0x2a4   :  { %v483_v3 = vadd.f32 %v722_v36, %v673_v37 }
 0x2b2   :  { %v755_v38 = vpop.f32.mrb[4].mxu1 }
 0x2b3   :  { %v756_v39 = vpop.f32.mrb[5].mxu1 }
 0x2b4   :  { %v757_v40 = vadd.f32 %v756_v39, %v755_v38 }
 0x2b6   :  { %v553_v41 = vadd.f32 %v757_v40, %v483_v3 }
 0x2b8   :  { %v556_v42 = vmax.f32 %v553_v41, 0.0 }
 0x2ba   :  { %835 = vmatmul.mubr.f32.vlgmr.msra.gmra.mrb[4].mxu0 %v556_v42 }
 0x38d   :  { %v646_v44 = vpop.f32.mrb[4].mxu0 }
 0x38e   :  { %v647_v45 = vadd.f32 %v674_v43, %v646_v44  ;;  %v836_v46 = vpop.f32.mrb[5].mxu0 }
 0x390   :  { %651 = vst.msk [vmem:[#allocation3] sm:$0x3] %vm650_vm4, %v647_v45 }
 0x391   :  { %990 = shalt.err (!%p987_p4)
}
 0x392   :  { %s991_s15 = scalar_lea.hbm %s1503_s9, 32 }
 0x393   :  { %p992_p5 = scmp.ne.s32.totalorder %s1503_s9, %s991_s15  ;;  %p995_p6 = scmp.lt.u32.totalorder %s991_s15, %s1503_s9 }
 0x395   :  { %p997_p7 = pnand %p995_p6, %p992_p5 }
 0x397   :  { %1000 = shalt.err (!%p997_p7)
}
 0x398   :  { %661 = dma.vmem_to_hbm [thread:$0]  %s659_s12, 32, %s1503_s9, [#allocation4]  }
 0x399   :  { %1001 = dma.done.wait [#allocation4], 32  }
 0x39a   :  { %1002 = vsyncadd [#allocation4], 4294967264 }
 0x39b   :  { %665 = vsyncpa [#allocation4], 1 }

</bundles_post_ra>
